<compile_context>
chip_gen: v6e
topology: v6e:2x2x1
jax: 0.10.0
libtpu: 0.0.40
codegen_flags: <defaults>
</compile_context>

<pallas_src>
import functools

import jax
import jax.numpy as jnp
from jax.experimental import pallas as pl
from jax.experimental.pallas import tpu as pltpu

C_IN = 256              # fixed by the module definition
NUM_CLASS = 3           # synthetic example
C_OUT = NUM_CLASS + 5   # [cls (num_class) | reg (4) | center (1)]


# ----------------------------------------------------------------------------
# Kernel
# ----------------------------------------------------------------------------
def head_kernel(x_ref, w_ref, b_ref, o_ref, *, num_class):
    """One (channels, tm) column-tile of the collapsed head.

    x_ref : (256, tm)         f32 input columns (one spatial pos per column)
    w_ref : (c_out_pad, 256)  f32 folded weight, rows in [cls | reg | center]
    b_ref : (c_out_pad, 1)    f32 folded bias
    o_ref : (c_out_pad, tm)   f32 output rows in [cls | reg | center] order
    """
    h = jnp.dot(w_ref[...], x_ref[...],
                preferred_element_type=jnp.float32) + b_ref[...]   # (c_out_pad, tm)

    # Row-wise activation selection: reg rows -> exp, everything else -> sigmoid.
    row = jax.lax.broadcasted_iota(jnp.int32, h.shape, 0)
    is_reg = (row >= num_class) & (row < num_class + 4)

    # One exp per element; sigmoid(h) = 1 / (1 + exp(-h)) via EUP reciprocal.
    t = jnp.exp(jnp.where(is_reg, h, -h))
    out = jnp.where(is_reg, t, pl.reciprocal(1.0 + t, approx=True))
    o_ref[...] = out.astype(o_ref.dtype)


# ----------------------------------------------------------------------------
# Weight folding (exact affine composition — the module has no nonlinearities
# between its 1x1 convs).  Call once; reuse the folded weights for inference.
# ----------------------------------------------------------------------------
def fold_head_params(params, *, num_class=NUM_CLASS):
    (wc, bc, wr, br, w_cls, b_cls, w_ctr, b_ctr, w_reg, b_reg) = params

    def fold_tower(w_stack, b_stack):
        A = w_stack[0]
        v = b_stack[0]
        for i in range(1, 4):
            A = w_stack[i] @ A
            v = w_stack[i] @ v + b_stack[i]
        return A, v                              # y = A @ x + v

    Ac, vc = fold_tower(wc, bc)                  # cls/center tower
    Ar, vr = fold_tower(wr, br)                  # reg tower

    # Rows in output order: [cls | reg | center].
    w_eff = jnp.concatenate([w_cls @ Ac, w_reg @ Ar, w_ctr @ Ac], axis=0)
    b_eff = jnp.concatenate(
        [w_cls @ vc + b_cls, w_reg @ vr + b_reg, w_ctr @ vc + b_ctr], axis=0)
    return w_eff.astype(jnp.float32), b_eff.astype(jnp.float32)


# ----------------------------------------------------------------------------
# Forward wrapper
# ----------------------------------------------------------------------------
def _pick_tile(hw):
    """Largest lane tile (<=2048) dividing hw, else one with <=12.5% padding."""
    cands = (2048, 1024, 512, 256, 128)
    for c in cands:
        if hw % c == 0:
            return c
    for c in cands:
        if (-(-hw // c) * c) - hw <= hw // 8:
            return c
    return 128


def head_forward(x_nchw, w_eff, b_eff, *, num_class=NUM_CLASS):
    """x_nchw: (N, 256, H, W) f32 -> (N, num_class+5, H, W) f32."""
    N, C, H, W = x_nchw.shape
    assert C == C_IN
    HW = H * W
    c_out = w_eff.shape[0]
    assert c_out == num_class + 5

    tm = _pick_tile(HW)
    # v7x megacore balance: keep at least 2 grid steps so both TCs get work.
    while tm > 128 and N * (-(-HW // tm)) < 2:
        tm //= 2
    HW_pad = -(-HW // tm) * tm
    c_out_pad = -(-c_out // 8) * 8               # sublane-aligned output rows

    x3 = x_nchw.reshape(N, C, HW)                # free reshape, no transpose
    if HW_pad != HW:
        x3 = jnp.pad(x3, ((0, 0), (0, 0), (0, HW_pad - HW)))

    w_pad = w_eff
    b_pad = b_eff[:, None]
    if c_out_pad != c_out:
        w_pad = jnp.pad(w_pad, ((0, c_out_pad - c_out), (0, 0)))
        b_pad = jnp.pad(b_pad, ((0, c_out_pad - c_out), (0, 0)))

    kernel = functools.partial(head_kernel, num_class=num_class)

    out3 = pl.pallas_call(
        kernel,
        out_shape=jax.ShapeDtypeStruct((N, c_out_pad, HW_pad), jnp.float32),
        grid_spec=pltpu.PrefetchScalarGridSpec(
            num_scalar_prefetch=0,
            grid=(N, HW_pad // tm),
            in_specs=[
                pl.BlockSpec((None, C, tm), lambda n, j: (n, 0, j)),    # x tile
                pl.BlockSpec((c_out_pad, C), lambda n, j: (0, 0)),      # folded W
                pl.BlockSpec((c_out_pad, 1), lambda n, j: (0, 0)),      # folded b
            ],
            out_specs=pl.BlockSpec((None, c_out_pad, tm), lambda n, j: (n, 0, j)),
        ),
        compiler_params=pltpu.CompilerParams(
            dimension_semantics=("parallel", "parallel")),
    )(x3, w_pad, b_pad)

    out = out3[:, :c_out, :HW]
    return out.reshape(N, c_out, H, W)


# ----------------------------------------------------------------------------
# Synthetic parameters + pure-JAX reference (un-folded, sequential layers)
# ----------------------------------------------------------------------------
def init_params(key, *, num_class=NUM_CLASS):
    """Deterministic synthetic parameters in PyTorch (out, in) orientation."""
    keys = jax.random.split(key, 10)
    s = 0.05  # keep magnitudes sane through 5 stacked linear layers
    wc = jax.random.normal(keys[0], (4, C_IN, C_IN), jnp.float32) * s
    bc = jax.random.normal(keys[1], (4, C_IN), jnp.float32) * s
    wr = jax.random.normal(keys[2], (4, C_IN, C_IN), jnp.float32) * s
    br = jax.random.normal(keys[3], (4, C_IN), jnp.float32) * s
    w_cls = jax.random.normal(keys[4], (num_class, C_IN), jnp.float32) * s
    b_cls = jax.random.normal(keys[5], (num_class,), jnp.float32) * s
    w_ctr = jax.random.normal(keys[6], (1, C_IN), jnp.float32) * s
    b_ctr = jax.random.normal(keys[7], (1,), jnp.float32) * s
    w_reg = jax.random.normal(keys[8], (4, C_IN), jnp.float32) * s
    b_reg = jax.random.normal(keys[9], (4,), jnp.float32) * s
    return (wc, bc, wr, br, w_cls, b_cls, w_ctr, b_ctr, w_reg, b_reg)


def head_reference(x_nchw, params, *, num_class=NUM_CLASS):
    """Pure-JAX f32 reference matching the PyTorch forward semantics."""
    (wc, bc, wr, br, w_cls, b_cls, w_ctr, b_ctr, w_reg, b_reg) = params
    N, C, H, W = x_nchw.shape
    x = x_nchw.reshape(N, C, H * W)

    def layer(w, b, z):
        return jnp.einsum('oc,ncp->nop', w, z) + b[None, :, None]

    cc = x
    rf = x
    for i in range(4):
        cc = layer(wc[i], bc[i], cc)
        rf = layer(wr[i], br[i], rf)
    cls = jax.nn.sigmoid(layer(w_cls, b_cls, cc))
    ctr = jax.nn.sigmoid(layer(w_ctr, b_ctr, cc))
    reg = jnp.exp(layer(w_reg, b_reg, rf))
    out = jnp.concatenate([cls, reg, ctr], axis=1)   # [cls | reg | center]
    return out.reshape(N, num_class + 5, H, W)


if __name__ == "__main__":
    key = jax.random.PRNGKey(0)
    k_x, k_p = jax.random.split(key)

    # Small example consistent with the module: N=2, C=256, H=W=16.
    x = jax.random.normal(k_x, (2, C_IN, 16, 16), jnp.float32)
    params = init_params(k_p)

    # Fold the affine stack once (weight preprocessing, not in the hot path).
    w_eff, b_eff = fold_head_params(params, num_class=NUM_CLASS)

    fwd = jax.jit(functools.partial(head_forward, num_class=NUM_CLASS))
    out = jax.block_until_ready(fwd(x, w_eff, b_eff))

    ref = head_reference(x, params)
    assert out.shape == (2, NUM_CLASS + 5, 16, 16), out.shape
    # f32 weight composition + approximate EUP reciprocal vs. sequential f32
    # reference: differences are small; use a modest tolerance.
    assert jnp.allclose(out, ref, atol=1e-2, rtol=1e-2), \
        float(jnp.max(jnp.abs(out - ref)))

    print("KERNEL_OK")
</pallas_src>

<mosaic_0001>
module attributes {stable_mosaic.version = 11 : i64} {
  func.func @head_kernel(%arg0: i32, %arg1: i32, %arg2: memref<1x256x256xf32, #tpu.memory_space<vmem>>, %arg3: memref<8x256xf32, #tpu.memory_space<vmem>>, %arg4: memref<8x1xf32, #tpu.memory_space<vmem>>, %arg5: memref<1x8x256xf32, #tpu.memory_space<vmem>>) attributes {dimension_semantics = [#tpu.dimension_semantics<parallel>, #tpu.dimension_semantics<parallel>], iteration_bounds = array<i64: 2, 1>, scalar_prefetch = 0 : i64, scratch_operands = 0 : i64, tpu.core_type = #tpu.core_type<tc>, window_params = [{transform_indices = @transform_0, window_bounds = array<i64: 1, 256, 256>}, {pipeline_mode = #tpu.pipeline_mode<synchronous>, transform_indices = @transform_1, window_bounds = array<i64: 8, 256>}, {pipeline_mode = #tpu.pipeline_mode<synchronous>, transform_indices = @transform_2, window_bounds = array<i64: 8, 1>}, {transform_indices = @transform_3, window_bounds = array<i64: 1, 8, 256>}]} {
    %c0 = arith.constant 0 : index
    %c0_0 = arith.constant 0 : index
    %0 = vector.load %arg3[%c0, %c0_0] : memref<8x256xf32, #tpu.memory_space<vmem>>, vector<8x256xf32>
    %c0_1 = arith.constant 0 : index
    %c0_2 = arith.constant 0 : index
    %c0_3 = arith.constant 0 : index
    %1 = vector.load %arg2[%c0_1, %c0_2, %c0_3] : memref<1x256x256xf32, #tpu.memory_space<vmem>>, vector<1x256x256xf32>
    %2 = vector.shape_cast %1 : vector<1x256x256xf32> to vector<256x256xf32>
    %cst = arith.constant dense<0.000000e+00> : vector<8x256xf32>
    %3 = tpu.matmul %0, %2, %cst {dimension_numbers = #tpu.dot_dimension_numbers<[1], [0], [0], [1], [0, 0, 1, 1], [], []>} : vector<8x256xf32>, vector<256x256xf32>, vector<8x256xf32> -> vector<8x256xf32>
    %c0_4 = arith.constant 0 : index
    %c0_5 = arith.constant 0 : index
    %4 = vector.load %arg4[%c0_4, %c0_5] : memref<8x1xf32, #tpu.memory_space<vmem>>, vector<8x1xf32>
    %5 = vector.broadcast %4 : vector<8x1xf32> to vector<8x256xf32>
    %6 = arith.addf %3, %5 : vector<8x256xf32>
    %7 = tpu.iota {dimensions = array<i32: 0>} : vector<8x256xi32>
    %c3_i32 = arith.constant 3 : i32
    %8 = vector.broadcast %c3_i32 : i32 to vector<8x256xi32>
    %9 = arith.cmpi sge, %7, %8 : vector<8x256xi32>
    %c7_i32 = arith.constant 7 : i32
    %10 = vector.broadcast %c7_i32 : i32 to vector<8x256xi32>
    %11 = arith.cmpi slt, %7, %10 : vector<8x256xi32>
    %12 = arith.andi %9, %11 : vector<8x256xi1>
    %cst_6 = arith.constant 0.000000e+00 : f32
    %13 = vector.broadcast %cst_6 : f32 to vector<8x256xf32>
    %14 = arith.subf %13, %6 : vector<8x256xf32>
    %15 = arith.select %12, %6, %14 : vector<8x256xi1>, vector<8x256xf32>
    %16 = math.exp %15 : vector<8x256xf32>
    %cst_7 = arith.constant 1.000000e+00 : f32
    %17 = vector.broadcast %cst_7 : f32 to vector<8x256xf32>
    %18 = arith.addf %17, %16 : vector<8x256xf32>
    %19 = tpu.reciprocal %18 {approx = true} : vector<8x256xf32> -> vector<8x256xf32>
    %20 = arith.select %12, %16, %19 : vector<8x256xi1>, vector<8x256xf32>
    %c0_8 = arith.constant 0 : index
    %c0_9 = arith.constant 0 : index
    %c0_10 = arith.constant 0 : index
    %21 = vector.load %arg5[%c0_8, %c0_9, %c0_10] : memref<1x8x256xf32, #tpu.memory_space<vmem>>, vector<1x8x256xf32>
    %22 = vector.shape_cast %21 : vector<1x8x256xf32> to vector<8x256xf32>
    %23 = vector.shape_cast %20 : vector<8x256xf32> to vector<1x8x256xf32>
    tpu.vector_store %arg5[%c0_8, %c0_9, %c0_10], %23 {strides = array<i32>} : memref<1x8x256xf32, #tpu.memory_space<vmem>>, vector<1x8x256xf32>,
    return
  }
  func.func @transform_0(%arg0: i32, %arg1: i32) -> (i32, i32, i32) {
    %c0_i32 = arith.constant 0 : i32
    %c0_i32_0 = arith.constant 0 : i32
    return %arg0, %c0_i32, %arg1 : i32, i32, i32
  }
  func.func @transform_1(%arg0: i32, %arg1: i32) -> (i32, i32) {
    %c0_i32 = arith.constant 0 : i32
    %c0_i32_0 = arith.constant 0 : i32
    %c0_i32_1 = arith.constant 0 : i32
    return %c0_i32, %c0_i32_0 : i32, i32
  }
  func.func @transform_2(%arg0: i32, %arg1: i32) -> (i32, i32) {
    %c0_i32 = arith.constant 0 : i32
    %c0_i32_0 = arith.constant 0 : i32
    %c0_i32_1 = arith.constant 0 : i32
    return %c0_i32, %c0_i32_0 : i32, i32
  }
  func.func @transform_3(%arg0: i32, %arg1: i32) -> (i32, i32, i32) {
    %c0_i32 = arith.constant 0 : i32
    %c0_i32_0 = arith.constant 0 : i32
    return %arg0, %c0_i32, %arg1 : i32, i32, i32
  }
}

</mosaic_0001>

<bundles_post_ra>
// kernel: head_forward.1
= control target key start
LH: loop header
LB: loop body
LE: loop exit
PB: predicated region body
PF: predicated region fallthrough
CT: control target
= control target key end

     0   :  { %s553_s12 = smov 0   ;;  %s555_s13 = smov 0   ;;  %s677_s0 = inlined_call_operand.vmem [shape: f32[2,256,256], index: 0, kind: input, shape index: {}]   ;;  %s678_s1 = inlined_call_operand.vmem [shape: f32[8,256], index: 1, kind: input, shape index: {}]   ;;  %s679_s2 = inlined_call_operand.vmem [shape: f32[8,1], index: 2, kind: input, shape index: {}]   ;;  %s680_s3 = inlined_call_operand.vmem [shape: f32[2,8,256], index: 3, kind: output, shape index: {}]  }
   0x1   :  { %s557_s14 = smov 0  }
   0x2 LB: > { %s25_s15 = sadd.s32 1, %s526_s13  ;;  %p465_p0 = scmp.ge.s32.totalorder %s530_s14, 1  ;;  %s530_s14 = sphi %s557_s14, %s13_s14   ;;  %s526_s13 = sphi %s555_s13, %s684_s13   ;;  %s522_s12 = sphi %s553_s12, %s683_s12  }
   0x3   : > { %p27_p1 = scmp.ge.s32.totalorder %s25_s15, 2  ;;  %p158_p2 = scmp.lt.s32.totalorder %s530_s14, 3 }
   0x5   : > { %s686_s15 = smov (%p27_p1, %s25_s15), 0  ;;  %p159_p3 = pnand %p465_p0, %p158_p2 }
   0x6   : > { %p191_p4 = scmp.lt.s32.totalorder (!%p159_p3), %s522_s12, 1 }
   0x7   : > { %162 = sbr.rel (%p159_p3) target bundleno = 314 (0x13a), region = 32 }
   0xc   : > { %v211_v0 = vld [vmem:[%s678_s1 + $0x8] sm:$0xff]  ;;  %v276_v1 = vld [vmem:[%s679_s2] sm:$0xff]  ;;  %v532_v2 = vmov 0   ;;  %s688_s12 = smov (!%p191_p4, %s522_s12), 1 }
   0xd   : > { %346 = vmatprep.mubr.f32.mxu0 %v211_v0  ;;  %499 = vset.pattern.permute.xlu0 %v532_v2  ;;  %s472_s20 = sshll.u32 %s688_s12, 9  ;;  %s473_s26 = sshll.u32 %s688_s12, 4 }
   0xe   : > { %279 = vperm.xlu0 %499, %v276_v1   ;;  %s583_s23 = scalar_lea.vmem %s677_s0, %s472_s20  ;;  %s208_s29 = scalar_lea.vmem %s680_s3, %s473_s26 }
   0xf   : > { %v243_v3 = vld [vmem:[%s583_s23 + $0xf8] sm:$0xff]  ;;  %v242_v4 = vld [vmem:[%s583_s23 + $0xf0] sm:$0xff]  ;;  %v241_v5 = vld [vmem:[%s583_s23 + $0xe8] sm:$0xff] }
  0x10   : > { %282 = vmatprep.subr.mxu0 %v243_v3  ;;  %v240_v6 = vld [vmem:[%s583_s23 + $0xe0] sm:$0xff]  ;;  %v239_v7 = vld [vmem:[%s583_s23 + $0xd8] sm:$0xff]  ;;  %v238_v8 = vld [vmem:[%s583_s23 + $0xd0] sm:$0xff] }
  0x11   : > { %283 = vmatpush1.msra.mxu0 %v242_v4  ;;  %v237_v9 = vld [vmem:[%s583_s23 + $0xc8] sm:$0xff]  ;;  %v236_v10 = vld [vmem:[%s583_s23 + $0xc0] sm:$0xff]  ;;  %v235_v11 = vld [vmem:[%s583_s23 + $0xb8] sm:$0xff]  ;;  %v353_v4 = vlaneseq }
  0x12   : > { %284 = vmatprep.subr.mxu0 %v241_v5  ;;  %v234_v12 = vld [vmem:[%s583_s23 + $0xb0] sm:$0xff]  ;;  %v233_v13 = vld [vmem:[%s583_s23 + $0xa8] sm:$0xff]  ;;  %v232_v14 = vld [vmem:[%s583_s23 + $0xa0] sm:$0xff] }
  0x13   : > { %285 = vmatpush1.msra.mxu0 %v240_v6  ;;  %v231_v15 = vld [vmem:[%s583_s23 + $0x98] sm:$0xff]  ;;  %v230_v16 = vld [vmem:[%s583_s23 + $0x90] sm:$0xff]  ;;  %v229_v17 = vld [vmem:[%s583_s23 + $0x88] sm:$0xff]  ;;  %v354_v5 = vshrl.u32 %v353_v4, 7 }
  0x14   : > { %286 = vmatprep.subr.mxu0 %v239_v7  ;;  %v228_v18 = vld [vmem:[%s583_s23 + $0x80] sm:$0xff]  ;;  %v227_v19 = vld [vmem:[%s583_s23 + $0x78] sm:$0xff]  ;;  %v226_v20 = vld [vmem:[%s583_s23 + $0x70] sm:$0xff] }
  0x15   : > { %287 = vmatpush1.msra.mxu0 %v238_v8  ;;  %v225_v21 = vld [vmem:[%s583_s23 + $0x68] sm:$0xff]  ;;  %v224_v22 = vld [vmem:[%s583_s23 + $0x60] sm:$0xff]  ;;  %v223_v23 = vld [vmem:[%s583_s23 + $0x58] sm:$0xff]  ;;  %vm355_vm0 = vcmp.ge.s32.totalorder %v354_v5, 3  ;;  %vm356_vm1 = vcmp.lt.s32.totalorder %v354_v5, 7 }
  0x16   : > { %288 = vmatprep.subr.mxu0 %v237_v9  ;;  %v222_v24 = vld [vmem:[%s583_s23 + $0x50] sm:$0xff]  ;;  %v221_v25 = vld [vmem:[%s583_s23 + $0x48] sm:$0xff]  ;;  %v220_v26 = vld [vmem:[%s583_s23 + $0x40] sm:$0xff] }
  0x17   : > { %289 = vmatpush1.msra.mxu0 %v236_v10  ;;  %v219_v27 = vld [vmem:[%s583_s23 + $0x38] sm:$0xff]  ;;  %v218_v28 = vld [vmem:[%s583_s23 + $0x30] sm:$0xff]  ;;  %v217_v29 = vld [vmem:[%s583_s23 + $0x28] sm:$0xff] }
  0x18   : > { %290 = vmatprep.subr.mxu0 %v235_v11  ;;  %v216_v30 = vld [vmem:[%s583_s23 + $0x20] sm:$0xff]  ;;  %v215_v31 = vld [vmem:[%s583_s23 + $0x18] sm:$0xff]  ;;  %v214_v32 = vld [vmem:[%s583_s23 + $0x10] sm:$0xff] }
  0x19   : > { %291 = vmatpush1.msra.mxu0 %v234_v12  ;;  %v213_v33 = vld [vmem:[%s583_s23 + $0x8] sm:$0xff]  ;;  %v212_v34 = vld [vmem:[%s583_s23] sm:$0xff]  ;;  %v275_v35 = vld [vmem:[%s583_s23 + $0x1f8] sm:$0xff] }
  0x1a   : > { %292 = vmatprep.subr.mxu0 %v233_v13  ;;  %v274_v36 = vld [vmem:[%s583_s23 + $0x1f0] sm:$0xff]  ;;  %v273_v37 = vld [vmem:[%s583_s23 + $0x1e8] sm:$0xff]  ;;  %v272_v38 = vld [vmem:[%s583_s23 + $0x1e0] sm:$0xff] }
  0x1b   : > { %293 = vmatpush1.msra.mxu0 %v232_v14  ;;  %v271_v39 = vld [vmem:[%s583_s23 + $0x1d8] sm:$0xff]  ;;  %v270_v40 = vld [vmem:[%s583_s23 + $0x1d0] sm:$0xff]  ;;  %v269_v41 = vld [vmem:[%s583_s23 + $0x1c8] sm:$0xff] }
  0x1c   : > { %294 = vmatprep.subr.mxu0 %v231_v15  ;;  %v268_v42 = vld [vmem:[%s583_s23 + $0x1c0] sm:$0xff]  ;;  %v267_v43 = vld [vmem:[%s583_s23 + $0x1b8] sm:$0xff]  ;;  %v266_v44 = vld [vmem:[%s583_s23 + $0x1b0] sm:$0xff] }
  0x1d   : > { %295 = vmatpush1.msra.mxu0 %v230_v16  ;;  %v265_v45 = vld [vmem:[%s583_s23 + $0x1a8] sm:$0xff]  ;;  %v264_v46 = vld [vmem:[%s583_s23 + $0x1a0] sm:$0xff]  ;;  %v263_v47 = vld [vmem:[%s583_s23 + $0x198] sm:$0xff] }
  0x1e   : > { %296 = vmatprep.subr.mxu0 %v229_v17  ;;  %v262_v48 = vld [vmem:[%s583_s23 + $0x190] sm:$0xff]  ;;  %v261_v49 = vld [vmem:[%s583_s23 + $0x188] sm:$0xff]  ;;  %v260_v50 = vld [vmem:[%s583_s23 + $0x180] sm:$0xff] }
  0x1f   : > { %297 = vmatpush1.msra.mxu0 %v228_v18  ;;  %v259_v51 = vld [vmem:[%s583_s23 + $0x178] sm:$0xff]  ;;  %v258_v52 = vld [vmem:[%s583_s23 + $0x170] sm:$0xff]  ;;  %v257_v53 = vld [vmem:[%s583_s23 + $0x168] sm:$0xff] }
  0x20   : > { %298 = vmatprep.subr.mxu0 %v227_v19  ;;  %v256_v54 = vld [vmem:[%s583_s23 + $0x160] sm:$0xff]  ;;  %v255_v55 = vld [vmem:[%s583_s23 + $0x158] sm:$0xff]  ;;  %v254_v56 = vld [vmem:[%s583_s23 + $0x150] sm:$0xff] }
  0x21   : > { %299 = vmatpush1.msra.mxu0 %v226_v20  ;;  %v253_v57 = vld [vmem:[%s583_s23 + $0x148] sm:$0xff]  ;;  %v252_v58 = vld [vmem:[%s583_s23 + $0x140] sm:$0xff]  ;;  %v251_v59 = vld [vmem:[%s583_s23 + $0x138] sm:$0xff] }
  0x22   : > { %300 = vmatprep.subr.mxu0 %v225_v21  ;;  %v250_v60 = vld [vmem:[%s583_s23 + $0x130] sm:$0xff]  ;;  %v249_v61 = vld [vmem:[%s583_s23 + $0x128] sm:$0xff]  ;;  %v248_v62 = vld [vmem:[%s583_s23 + $0x120] sm:$0xff] }
  0x23   : > { %301 = vmatpush1.msra.mxu0 %v224_v22  ;;  %v247_v63 = vld [vmem:[%s583_s23 + $0x118] sm:$0xff]  ;;  %v246_v0 = vld [vmem:[%s583_s23 + $0x110] sm:$0xff]  ;;  %v245_v1 = vld [vmem:[%s583_s23 + $0x108] sm:$0xff] }
  0x24   : > { %302 = vmatprep.subr.mxu0 %v223_v23  ;;  %v244_v2 = vld [vmem:[%s583_s23 + $0x100] sm:$0xff]  ;;  %vm652_vm2 = vmand %vm355_vm0, %vm356_vm1 }
  0x25   : > { %303 = vmatpush1.msra.mxu0 %v222_v24  ;;  %v210_v3 = vld [vmem:[%s678_s1] sm:$0xff] }
  0x26   : > { %304 = vmatprep.subr.mxu0 %v221_v25 }
  0x27   : > { %305 = vmatpush1.msra.mxu0 %v220_v26 }
  0x28   : > { %306 = vmatprep.subr.mxu0 %v219_v27 }
  0x29   : > { %307 = vmatpush1.msra.mxu0 %v218_v28 }
  0x2a   : > { %308 = vmatprep.subr.mxu0 %v217_v29 }
  0x2b   : > { %309 = vmatpush1.msra.mxu0 %v216_v30 }
  0x2c   : > { %310 = vmatprep.subr.mxu0 %v215_v31 }
  0x2d   : > { %311 = vmatpush1.msra.mxu0 %v214_v32 }
  0x2e   : > { %312 = vmatprep.subr.mxu0 %v213_v33 }
  0x2f   : > { %313 = vmatpush1.msra.mxu0 %v212_v34 }
  0x30   : > { %314 = vmatprep.subr.mxu0 %v275_v35 }
  0x31   : > { %315 = vmatpush2.msra.mxu0 %v274_v36 }
  0x32   : > { %316 = vmatprep.subr.mxu0 %v273_v37 }
  0x33   : > { %317 = vmatpush2.msra.mxu0 %v272_v38 }
  0x34   : > { %318 = vmatprep.subr.mxu0 %v271_v39 }
  0x35   : > { %319 = vmatpush2.msra.mxu0 %v270_v40 }
  0x36   : > { %320 = vmatprep.subr.mxu0 %v269_v41 }
  0x37   : > { %321 = vmatpush2.msra.mxu0 %v268_v42 }
  0x38   : > { %322 = vmatprep.subr.mxu0 %v267_v43 }
  0x39   : > { %323 = vmatpush2.msra.mxu0 %v266_v44 }
  0x3a   : > { %324 = vmatprep.subr.mxu0 %v265_v45 }
  0x3b   : > { %325 = vmatpush2.msra.mxu0 %v264_v46 }
  0x3c   : > { %326 = vmatprep.subr.mxu0 %v263_v47 }
  0x3d   : > { %327 = vmatpush2.msra.mxu0 %v262_v48 }
  0x3e   : > { %328 = vmatprep.subr.mxu0 %v261_v49 }
  0x3f   : > { %329 = vmatpush2.msra.mxu0 %v260_v50 }
  0x40   : > { %330 = vmatprep.subr.mxu0 %v259_v51 }
  0x41   : > { %331 = vmatpush2.msra.mxu0 %v258_v52 }
  0x42   : > { %332 = vmatprep.subr.mxu0 %v257_v53 }
  0x43   : > { %333 = vmatpush2.msra.mxu0 %v256_v54 }
  0x44   : > { %334 = vmatprep.subr.mxu0 %v255_v55 }
  0x45   : > { %335 = vmatpush2.msra.mxu0 %v254_v56 }
  0x46   : > { %336 = vmatprep.subr.mxu0 %v253_v57 }
  0x47   : > { %337 = vmatpush2.msra.mxu0 %v252_v58 }
  0x48   : > { %338 = vmatprep.subr.mxu0 %v251_v59 }
  0x49   : > { %339 = vmatpush2.msra.mxu0 %v250_v60 }
  0x4a   : > { %340 = vmatprep.subr.mxu0 %v249_v61 }
  0x4b   : > { %341 = vmatpush2.msra.mxu0 %v248_v62 }
  0x4c   : > { %342 = vmatprep.subr.mxu0 %v247_v63 }
  0x4d   : > { %343 = vmatpush2.msra.mxu0 %v246_v0 }
  0x4e   : > { %344 = vmatprep.subr.mxu0 %v245_v1 }
  0x4f   : > { %345 = vmatpush2.msra.mxu0 %v244_v2 }
  0x50   : > { %347 = vmatmul.mubr.f32.vlgmr.msra.gmra.mxu0 %v210_v3 }
  0x89   : > { %v280_v6 = vpop.permute.xlu0 %279 }
 0x110   : > { %v348_v7 = vpop.f32.mrf.mxu0 }
 0x111   : > { %v349_v8 = vadd.f32 %v348_v7, %v280_v6 }
 0x112   : > { %v350_v10 = vpop.f32.mrf.mxu0 }
 0x113   : > { %v358_v11 = vsub.f32 0.0, %v349_v8  ;;  %v351_v12 = vadd.f32 %v350_v10, %v280_v6 }
 0x115   : > { %v360_v13 = vsel %vm652_vm2, %v349_v8, %v358_v11  ;;  %v359_v14 = vsub.f32 0.0, %v351_v12 }
 0x116   : > { %v362_v15 = vmul.f32 1.442695, %v360_v13 }
 0x117   : > { %v361_v16 = vsel %vm652_vm2, %v351_v12, %v359_v14 }
 0x118   : > { %500 = vpow2.f32 %v362_v15  ;;  %v364_v17 = vmul.f32 1.442695, %v361_v16 }
 0x11a   : > { %502 = vpow2.f32 %v364_v17 }
 0x125   : > { %v501_v18 = vpop.eup %500 }
 0x126   : > { %v366_v19 = vadd.f32 1.0, %v501_v18 }
 0x127   : > { %v503_v20 = vpop.eup %502 }
 0x128   : > { %504 = vrcp.f32 %v366_v19  ;;  %v367_v21 = vadd.f32 1.0, %v503_v20 }
 0x12a   : > { %506 = vrcp.f32 %v367_v21 }
 0x135   : > { %v505_v22 = vpop.eup %504 }
 0x136   : > { %v370_v23 = vsel %vm652_vm2, %v501_v18, %v505_v22 }
 0x137   : > { %v507_v24 = vpop.eup %506  ;;  %372 = vst [vmem:[%s208_s29] sm:$0xff] %v370_v23 }
 0x138   : > { %v371_v25 = vsel %vm652_vm2, %v503_v20, %v507_v24 }
 0x139   : > { %373 = vst [vmem:[%s208_s29 + $0x8] sm:$0xff] %v371_v25 }
 0x13a PF: > { %s13_s14 = sadd.s32 1, %s530_s14   ;;  %s683_s12 = smov %s526_s13 }
 0x13b   : > { %p10_p5 = scmp.ge.s32.totalorder %s13_s14, 4   ;;  %s684_s13 = smov %s686_s15 }
 0x13d   :  { %12 = sbr.rel (!%p10_p5) target bundleno = 2 (0x2), region = 62 }

</bundles_post_ra>
